<compile_context>
chip_gen: v7x
topology: tpu7x:2x2x1
jax: 0.10.0
libtpu: 0.0.40
codegen_flags: <defaults>
</compile_context>

<pallas_src>
import jax
import jax.numpy as jnp
from jax.experimental import pallas as pl
from jax.experimental.pallas import tpu as pltpu

LANES = 128
TARGET_TILE_ROWS = 2048  # ~1 MiB f32 per input tile


def _sq_diff_sum_kernel(x_ref, y_ref, out_ref, acc_ref):
    i = pl.program_id(1)  # reduction axis (per shard)

    @pl.when(i == 0)
    def _():
        acc_ref[...] = jnp.zeros_like(acc_ref)

    # Cast to f32 immediately (v5e VPU has no bf16 math); accumulate in f32.
    x = x_ref[...].astype(jnp.float32)
    y = y_ref[...].astype(jnp.float32)
    d = x - y
    dd = d * d
    # Leading-axis fold (row_tile, 128) -> (row_tile//8, 8, 128) -> (8, 128):
    # pure VPU vadds, no XLU, no per-step scalar dependency chain.
    acc_ref[...] += jnp.sum(dd.reshape(-1, 8, LANES), axis=0)

    @pl.when(i == pl.num_programs(1) - 1)
    def _():
        # One-time epilogue: cross-lane/sublane reduce + scalar SMEM store.
        out_ref[0, 0] = jnp.sum(acc_ref[...])


def rmse_loss(x, y):
    assert x.shape == y.shape, "x and y must have identical shapes"
    n = x.size
    xf = x.reshape(-1)
    yf = y.reshape(-1)

    full_rows = n // LANES
    if full_rows < 8:
        # Too small to form even one (8, 128) tile: pure-JAX fallback.
        d = xf.astype(jnp.float32) - yf.astype(jnp.float32)
        return jnp.sqrt(jnp.sum(d * d) / jnp.float32(n))

    # Tile rows: multiple of 8, capped at TARGET_TILE_ROWS and at what fits.
    row_tile = min(TARGET_TILE_ROWS, (full_rows // 8) * 8)
    tiles = full_rows // row_tile
    # 2-way shard across TensorCores (v7x) when it divides evenly.
    num_shards = 2 if (tiles >= 2 and tiles % 2 == 0) else 1
    steps = tiles // num_shards
    bulk_rows = tiles * row_tile
    bulk = bulk_rows * LANES

    x2d = xf[:bulk].reshape(bulk_rows, LANES)
    y2d = yf[:bulk].reshape(bulk_rows, LANES)

    itemsize = jnp.dtype(x.dtype).itemsize
    partials = pl.pallas_call(
        _sq_diff_sum_kernel,
        out_shape=jax.ShapeDtypeStruct((num_shards, 1), jnp.float32),
        grid_spec=pltpu.PrefetchScalarGridSpec(
            num_scalar_prefetch=0,
            grid=(num_shards, steps),
            in_specs=[
                pl.BlockSpec((row_tile, LANES), lambda c, i: (c * steps + i, 0)),
                pl.BlockSpec((row_tile, LANES), lambda c, i: (c * steps + i, 0)),
            ],
            out_specs=pl.BlockSpec(
                (1, 1), lambda c, i: (c, 0),
                memory_space=pltpu.MemorySpace.SMEM,
            ),
            scratch_shapes=[pltpu.VMEM((8, LANES), jnp.float32)],
        ),
        compiler_params=pltpu.CompilerParams(
            dimension_semantics=("parallel", "arbitrary"),
            vmem_limit_bytes=32 * 1024 * 1024,
        ),
        cost_estimate=pl.CostEstimate(
            flops=3 * bulk,
            transcendentals=0,
            bytes_accessed=2 * bulk * itemsize + 4 * num_shards,
        ),
    )(x2d, y2d)

    sq_sum = jnp.sum(partials)

    # Un-tiled tail (< one tile): plain JAX, negligible next to the bulk.
    tail = n - bulk
    if tail:
        dt = xf[bulk:].astype(jnp.float32) - yf[bulk:].astype(jnp.float32)
        sq_sum = sq_sum + jnp.sum(dt * dt)

    return jnp.sqrt(sq_sum / jnp.float32(n))


if __name__ == "__main__":
    key = jax.random.PRNGKey(0)
    kx, ky = jax.random.split(key)
    # Shapes consistent with an NCHW-style tensor pair fed to the loss.
    x = jax.random.normal(kx, (2, 4, 16, 16), dtype=jnp.float32)
    y = jax.random.normal(ky, (2, 4, 16, 16), dtype=jnp.float32)

    loss = jax.block_until_ready(rmse_loss(x, y))

    # Reference check against plain JAX RMSE.
    ref = jnp.sqrt(jnp.mean((x - y) ** 2))
    assert jnp.allclose(loss, ref, rtol=1e-6, atol=1e-6), (loss, ref)

    print("KERNEL_OK")
</pallas_src>

<mosaic_0001>
module attributes {stable_mosaic.version = 11 : i64} {
  func.func @_sq_diff_sum_kernel(%arg0: i32, %arg1: i32, %arg2: memref<16x128xf32, #tpu.memory_space<vmem>>, %arg3: memref<16x128xf32, #tpu.memory_space<vmem>>, %arg4: memref<1x1xf32, #tpu.memory_space<smem>>, %arg5: memref<8x128xf32, #tpu.memory_space<vmem>>) attributes {dimension_semantics = [#tpu.dimension_semantics<parallel>, #tpu.dimension_semantics<arbitrary>], iteration_bounds = array<i64: 1, 1>, scalar_prefetch = 0 : i64, scratch_operands = 1 : i64, tpu.core_type = #tpu.core_type<tc>, window_params = [{transform_indices = @transform_0, window_bounds = array<i64: 16, 128>}, {transform_indices = @transform_1, window_bounds = array<i64: 16, 128>}, {transform_indices = @transform_2, window_bounds = array<i64: 1, 1>}]} {
    %c0_i32 = arith.constant 0 : i32
    %0 = arith.cmpi eq, %arg1, %c0_i32 : i32
    %1 = arith.extui %0 : i1 to i32
    %c0_i32_0 = arith.constant 0 : i32
    %2 = arith.cmpi ne, %1, %c0_i32_0 : i32
    scf.if %2 {
      %cst_10 = arith.constant 0.000000e+00 : f32
      %15 = vector.broadcast %cst_10 : f32 to vector<8x128xf32>
      %c0_11 = arith.constant 0 : index
      %c0_12 = arith.constant 0 : index
      %16 = vector.load %arg5[%c0_11, %c0_12] : memref<8x128xf32, #tpu.memory_space<vmem>>, vector<8x128xf32>
      tpu.vector_store %arg5[%c0_11, %c0_12], %15 {strides = array<i32>} : memref<8x128xf32, #tpu.memory_space<vmem>>, vector<8x128xf32>,
    } else {
    }
    %c0 = arith.constant 0 : index
    %c0_1 = arith.constant 0 : index
    %3 = vector.load %arg2[%c0, %c0_1] : memref<16x128xf32, #tpu.memory_space<vmem>>, vector<16x128xf32>
    %c0_2 = arith.constant 0 : index
    %c0_3 = arith.constant 0 : index
    %4 = vector.load %arg3[%c0_2, %c0_3] : memref<16x128xf32, #tpu.memory_space<vmem>>, vector<16x128xf32>
    %5 = arith.subf %3, %4 : vector<16x128xf32>
    %6 = arith.mulf %5, %5 : vector<16x128xf32>
    %c0_4 = arith.constant 0 : index
    %c0_5 = arith.constant 0 : index
    %7 = vector.load %arg5[%c0_4, %c0_5] : memref<8x128xf32, #tpu.memory_space<vmem>>, vector<8x128xf32>
    %8 = vector.shape_cast %6 : vector<16x128xf32> to vector<2x8x128xf32>
    %cst = arith.constant dense<0.000000e+00> : vector<8x128xf32>
    %9 = vector.multi_reduction <add>, %8, %cst [0] : vector<2x8x128xf32> to vector<8x128xf32>
    %10 = arith.addf %7, %9 : vector<8x128xf32>
    %c0_6 = arith.constant 0 : index
    %c0_7 = arith.constant 0 : index
    %11 = vector.load %arg5[%c0_6, %c0_7] : memref<8x128xf32, #tpu.memory_space<vmem>>, vector<8x128xf32>
    tpu.vector_store %arg5[%c0_6, %c0_7], %10 {strides = array<i32>} : memref<8x128xf32, #tpu.memory_space<vmem>>, vector<8x128xf32>,
    %c0_i32_8 = arith.constant 0 : i32
    %12 = arith.cmpi eq, %arg1, %c0_i32_8 : i32
    %13 = arith.extui %12 : i1 to i32
    %c0_i32_9 = arith.constant 0 : i32
    %14 = arith.cmpi ne, %13, %c0_i32_9 : i32
    scf.if %14 {
      %c0_10 = arith.constant 0 : index
      %c0_11 = arith.constant 0 : index
      %15 = vector.load %arg5[%c0_10, %c0_11] : memref<8x128xf32, #tpu.memory_space<vmem>>, vector<8x128xf32>
      %16 = vector.shape_cast %15 : vector<8x128xf32> to vector<1x8x128xf32>
      %cst_12 = arith.constant dense<0.000000e+00> : vector<1xf32>
      %17 = vector.multi_reduction <add>, %16, %cst_12 [1, 2] : vector<1x8x128xf32> to vector<1xf32>
      %18 = vector.shape_cast %17 : vector<1xf32> to vector<1x1x1xf32>
      %19 = vector.extract %18[0, 0, 0] : f32 from vector<1x1x1xf32>
      %c0_13 = arith.constant 0 : index
      %c0_14 = arith.constant 0 : index
      %20 = memref.load %arg4[%c0_13, %c0_14] : memref<1x1xf32, #tpu.memory_space<smem>>
      memref.store %19, %arg4[%c0_13, %c0_14] : memref<1x1xf32, #tpu.memory_space<smem>>
    } else {
    }
    return
  }
  func.func @transform_0(%arg0: i32, %arg1: i32) -> (i32, i32) {
    %c1_i32 = arith.constant 1 : i32
    %0 = arith.muli %arg0, %c1_i32 : i32
    %1 = arith.addi %0, %arg1 : i32
    %c0_i32 = arith.constant 0 : i32
    %c0_i32_0 = arith.constant 0 : i32
    return %1, %c0_i32 : i32, i32
  }
  func.func @transform_1(%arg0: i32, %arg1: i32) -> (i32, i32) {
    %c1_i32 = arith.constant 1 : i32
    %0 = arith.muli %arg0, %c1_i32 : i32
    %1 = arith.addi %0, %arg1 : i32
    %c0_i32 = arith.constant 0 : i32
    %c0_i32_0 = arith.constant 0 : i32
    return %1, %c0_i32 : i32, i32
  }
  func.func @transform_2(%arg0: i32, %arg1: i32) -> (i32, i32) {
    %c0_i32 = arith.constant 0 : i32
    %c0_i32_0 = arith.constant 0 : i32
    return %arg0, %c0_i32 : i32, i32
  }
}

</mosaic_0001>

<bundles_post_ra>
// kernel: tpu_custom_call.1
= control target key start
LH: loop header
LB: loop body
LE: loop exit
PB: predicated region body
PF: predicated region fallthrough
CT: control target
= control target key end

     0   :  { %7 = vsyncpa [#allocation4], 0  ;;  %s222_s0 = inlined_call_operand.hbm [shape: f32[16,128], index: 0, kind: input, shape index: {}]   ;;  %s223_s1 = inlined_call_operand.hbm [shape: f32[16,128], index: 1, kind: input, shape index: {}]   ;;  %s224_s2 = inlined_call_operand.hbm [shape: f32[1,1], index: 2, kind: output, shape index: {}]  }
   0x1   :  { %8 = vsyncpa [#allocation7], 0 }
   0x2   :  { %9 = vsyncpa [#allocation5], 0  ;;  %s166_s9 = smov [#allocation3]   ;;  %s106_s13 = scalar_lea.hbm %s222_s0, 256 }
   0x3   :  { %s19_s10 = sshll.u32 %s166_s9, 4  ;;  %p107_p0 = scmp.ne.s32.totalorder %s222_s0, %s106_s13  ;;  %s20_s10 = int_to_ptr.vmem [resolvable:$true] %s19_s10 }
   0x4   :  { %p110_p1 = scmp.lt.u32.totalorder %s106_s13, %s222_s0 }
   0x6   :  { %p112_p2 = pnand %p110_p1, %p107_p0 }
   0x8   :  { %115 = shalt.err (!%p112_p2)
}
   0x9   :  { %s116_s18 = scalar_lea.vmem %s20_s10, 256  ;;  %p121_p4 = scmp.lt.s32.totalorder %s20_s10, %s20_s10 }
   0xa   :  { %p117_p3 = scmp.ne.s32.totalorder %s20_s10, %s116_s18  ;;  %p122_p5 = scmp.lt.s32.totalorder %s116_s18, %s116_s18 }
   0xc   :  { %p123_p6 = por %p122_p5, %p121_p4 }
   0xe   :  { %p124_p7 = pnand %p123_p6, %p117_p3 }
  0x10   :  { %127 = shalt.err (!%p124_p7)
}
  0x11   :  { %s167_s19 = smov 128   ;;  %s168_s20 = smov 8  }
  0x12   :  { %25 = dma.hbm_to_vmem [thread:$0]  %s222_s0, 256, %s20_s10, [#allocation4], %s167_s19, %s167_s19, %s168_s20  }
  0x13   :  { %s169_s23 = smov [#allocation6]   ;;  %s128_s27 = scalar_lea.hbm %s223_s1, 256 }
  0x14   :  { %s35_s24 = sshll.u32 %s169_s23, 4  ;;  %p129_p8 = scmp.ne.s32.totalorder %s223_s1, %s128_s27  ;;  %s36_s24 = int_to_ptr.vmem [resolvable:$true] %s35_s24 }
  0x15   :  { %p132_p9 = scmp.lt.u32.totalorder %s128_s27, %s223_s1 }
  0x17   :  { %p134_p10 = pnand %p132_p9, %p129_p8 }
  0x19   :  { %137 = shalt.err (!%p134_p10)
}
  0x1a   :  { %s138_s4 = scalar_lea.vmem %s36_s24, 256  ;;  %p143_p12 = scmp.lt.s32.totalorder %s36_s24, %s36_s24 }
  0x1b   :  { %p139_p11 = scmp.ne.s32.totalorder %s36_s24, %s138_s4  ;;  %p144_p13 = scmp.lt.s32.totalorder %s138_s4, %s138_s4 }
  0x1d   :  { %p145_p0 = por %p144_p13, %p143_p12 }
  0x1f   :  { %p146_p1 = pnand %p145_p0, %p139_p11 }
  0x21   :  { %149 = shalt.err (!%p146_p1)
}
  0x22   :  { %41 = dma.hbm_to_vmem [thread:$0]  %s223_s1, 256, %s36_s24, [#allocation7], %s167_s19, %s167_s19, %s168_s20  }
  0x23   :  { %160 = dma.done.wait [#allocation4], 256  }
  0x24   :  { %161 = vsyncadd [#allocation4], 4294967040 }
  0x25   :  { %162 = dma.done.wait [#allocation7], 256  }
  0x26   :  { %163 = vsyncadd [#allocation7], 4294967040  ;;  %v57_v0 = vld [vmem:[#allocation3] sm:$0xff]  ;;  %v58_v1 = vld [vmem:[#allocation3 + $0x8] sm:$0xff]  ;;  %s150_s8 = scalar_lea.hbm %s224_s2, 16 }
  0x27   :  { %v59_v2 = vld [vmem:[#allocation6] sm:$0xff]  ;;  %v60_v3 = vld [vmem:[#allocation6 + $0x8] sm:$0xff]  ;;  %p151_p2 = scmp.ne.s32.totalorder %s224_s2, %s150_s8  ;;  %p154_p3 = scmp.lt.u32.totalorder %s150_s8, %s224_s2 }
  0x28   :  { %v61_v4 = vsub.f32 %v57_v0, %v59_v2  ;;  %v62_v5 = vsub.f32 %v58_v1, %v60_v3 }
  0x29   :  { %p156_p4 = pnand %p154_p3, %p151_p2 }
  0x2a   :  { %v63_v6 = vmul.f32 %v61_v4, %v61_v4  ;;  %v64_v7 = vmul.f32 %v62_v5, %v62_v5 }
  0x2c   :  { %v66_v8 = vadd.f32 %v64_v7, %v63_v6 }
  0x2e   :  { %73 = vadd.xlane.f32.xlu0 %v66_v8 }
  0xbb   :  { %v74_v9 = vpop.xlane.xlu0 %73 }
  0xbc   :  { %v75_v10 = vrot.slane %v74_v9, 4 }
  0xbe   :  { %v76_v11 = vadd.f32 %v75_v10, %v74_v9 }
  0xc0   :  { %v77_v12 = vrot.slane %v76_v11, 2 }
  0xc2   :  { %v78_v13 = vadd.f32 %v77_v12, %v76_v11 }
  0xc4   :  { %v79_v14 = vrot.slane %v78_v13, 1 }
  0xc6   :  { %v80_v15 = vadd.f32 %v79_v14, %v78_v13 }
  0xc8   :  { %99 = vpush %v80_v15 }
  0xf9   :  { %s100_s1 = spop %99 }
  0xfa   :  { %83 = sst [smem:[#allocation8]] %s100_s1 }
  0xfb   :  { %159 = shalt.err (!%p156_p4)
}
  0xfc   :  { %s170_s13 = smov [#allocation8]  }
  0xfd   :  { %91 = dma.smem_to_hbm %s170_s13, 16, %s224_s2, [#allocation5]  }
  0xfe   :  { %164 = dma.done.wait [#allocation5], 16  }
  0xff   :  { %165 = vsyncadd [#allocation5], 4294967280 }
 0x100   :  { %95 = sfence }
 0x101   :  { %96 = vsyncpa [#allocation4], 1 }
 0x102   :  { %97 = vsyncpa [#allocation7], 1 }
 0x103   :  { %98 = vsyncpa [#allocation5], 1 }

</bundles_post_ra>
